<compile_context>
chip_gen: v5e
topology: v5e:2x2
jax: 0.10.0
libtpu: 0.0.40
codegen_flags: <defaults>
</compile_context>

<pallas_src>
import functools

import jax
import jax.numpy as jnp
from jax.experimental import pallas as pl
from jax.experimental.pallas import tpu as pltpu


def _round_up(n, m):
    return ((n + m - 1) // m) * m


def _choose_tile_b(B):
    """Batch tile: full batch if tiny, else split into >=2 tiles (v7x megacore), cap at 1024."""
    if B <= 16:
        return B                                   # block == full dim, always legal
    return min(1024, _round_up(pl.cdiv(B, 2), 16))  # 16-aligned (bf16 sublane packing)


def _mlp_head_kernel(x_ref, w1_ref, b1_ref, w2_ref, b2_ref, w3_ref, b3_ref, out_ref):
    """Fused: Linear(D->512) + ReLU + Linear(512->128) + ReLU + Linear(128->A_pad) + Sigmoid.

    x is cast to bf16 in-kernel; matmuls run on the MXU in bf16 with f32 accumulation,
    biases / ReLU / sigmoid in f32. Dropout layers are inference-mode identities.
    """
    x = x_ref[...].astype(jnp.bfloat16)                                # (TILE_B, D_pad)

    h1 = jnp.dot(x, w1_ref[...], preferred_element_type=jnp.float32) + b1_ref[...]
    h1 = jnp.maximum(h1, 0.0)                                          # ReLU (+ Dropout id)

    h2 = jnp.dot(h1.astype(jnp.bfloat16), w2_ref[...],
                 preferred_element_type=jnp.float32) + b2_ref[...]
    h2 = jnp.maximum(h2, 0.0)                                          # ReLU (+ Dropout id)

    logits = jnp.dot(h2.astype(jnp.bfloat16), w3_ref[...],
                     preferred_element_type=jnp.float32) + b3_ref[...]
    out_ref[...] = jax.nn.sigmoid(logits).astype(out_ref.dtype)        # bf16 writeback


def prepare_classifier_params(params, attrs_num):
    """One-time parameter prep (NOT per-forward): pad, reshape biases, cast weights to bf16."""
    w1, b1, w2, b2, w3, b3 = params
    D, H1 = w1.shape
    H2 = w2.shape[1]

    d_pad = _round_up(D, 128)                     # K-pad (no-op for 512 / 2048 backbones)
    a_pad = _round_up(max(attrs_num, 128), 128)   # lane-dense output

    w1_p = jnp.zeros((d_pad, H1), jnp.float32).at[:D, :].set(w1)
    w3_p = jnp.zeros((H2, a_pad), jnp.float32).at[:, :attrs_num].set(w3)
    b3_p = jnp.zeros((1, a_pad), jnp.float32).at[:, :attrs_num].set(b3.reshape(1, -1))

    weights = (
        w1_p.astype(jnp.bfloat16),
        b1.reshape(1, -1).astype(jnp.float32),
        w2.astype(jnp.bfloat16),
        b2.reshape(1, -1).astype(jnp.float32),
        w3_p.astype(jnp.bfloat16),
        b3_p.astype(jnp.float32),
    )
    return {"weights": weights, "attrs_num": attrs_num}


@functools.partial(jax.jit, static_argnames=("attrs_num",))
def _head_forward(x, w1, b1, w2, b2, w3, b3, *, attrs_num):
    B = x.shape[0]
    x2d = x.reshape(B, -1)                        # x.view(x.size(0), -1)
    D = x2d.shape[1]
    d_pad, H1 = w1.shape
    H2, a_pad = w3.shape
    if D < d_pad:                                 # only for non-128-multiple feature dims
        x2d = jnp.pad(x2d, ((0, 0), (0, d_pad - D)))

    tile_b = _choose_tile_b(B)
    grid_b = pl.cdiv(B, tile_b)                   # ragged last block handled by Pallas

    flops = 2 * B * (d_pad * H1 + H1 * H2 + H2 * a_pad)
    bytes_accessed = (
        B * d_pad * x2d.dtype.itemsize                 # activations in (native dtype)
        + (w1.size + w2.size + w3.size) * 2            # bf16 weights
        + (b1.size + b2.size + b3.size) * 4            # f32 biases
        + B * a_pad * 2                                # bf16 output
    )
    cost = pl.CostEstimate(flops=flops,
                           transcendentals=2 * B * a_pad,   # sigmoid = exp + reciprocal
                           bytes_accessed=bytes_accessed)

    out = pl.pallas_call(
        _mlp_head_kernel,
        out_shape=jax.ShapeDtypeStruct((B, a_pad), jnp.bfloat16),
        grid=(grid_b,),
        in_specs=[
            # x tile streams with the grid; weights/biases keep block (0,0) -> resident.
            pl.BlockSpec((tile_b, d_pad), lambda i: (i, 0)),
            pl.BlockSpec((d_pad, H1), lambda i: (0, 0)),
            pl.BlockSpec((1, H1), lambda i: (0, 0)),
            pl.BlockSpec((H1, H2), lambda i: (0, 0)),
            pl.BlockSpec((1, H2), lambda i: (0, 0)),
            pl.BlockSpec((H2, a_pad), lambda i: (0, 0)),
            pl.BlockSpec((1, a_pad), lambda i: (0, 0)),
        ],
        out_specs=pl.BlockSpec((tile_b, a_pad), lambda i: (i, 0)),
        compiler_params=pltpu.CompilerParams(
            dimension_semantics=("parallel",),        # split batch tiles across TCs (v7x)
        ),
        cost_estimate=cost,
    )(x2d, w1, b1, w2, b2, w3, b3)

    return out[:, :attrs_num]                     # drop lane padding; bf16 probabilities


def feature_classifier_forward(x, head):
    """x: (B, C, H, W) or (B, D) backbone features. Returns (B, attrs_num) probabilities (bf16)."""
    w1, b1, w2, b2, w3, b3 = head["weights"]
    return _head_forward(x, w1, b1, w2, b2, w3, b3, attrs_num=head["attrs_num"])


def init_params(key, input_dim, attrs_num):
    """Deterministic synthetic weights matching the nn.Sequential shapes."""
    k1, k2, k3, k4, k5, k6 = jax.random.split(key, 6)
    w1 = jax.random.normal(k1, (input_dim, 512), jnp.float32) * 0.02
    b1 = jax.random.normal(k2, (512,), jnp.float32) * 0.02
    w2 = jax.random.normal(k3, (512, 128), jnp.float32) * 0.02
    b2 = jax.random.normal(k4, (128,), jnp.float32) * 0.02
    w3 = jax.random.normal(k5, (128, attrs_num), jnp.float32) * 0.02
    b3 = jax.random.normal(k6, (attrs_num,), jnp.float32) * 0.02
    return (w1, b1, w2, b2, w3, b3)


if __name__ == "__main__":
    selected_attrs = [f"attr_{i}" for i in range(40)]   # e.g. CelebA's 40 attributes
    attrs_num = len(selected_attrs)
    input_dim = 512                                      # Resnet18 head

    key = jax.random.PRNGKey(0)
    kx, kp = jax.random.split(key)

    # Resnet18 backbone emits (B, 512, 1, 1) features; the head flattens them like view().
    x = jax.random.normal(kx, (2, 512, 1, 1), jnp.float32)
    raw_params = init_params(kp, input_dim, attrs_num)
    head = prepare_classifier_params(raw_params, attrs_num)

    out = feature_classifier_forward(x, head)
    out = jax.block_until_ready(out)

    # Reference with matching bf16 matmul inputs / f32 accumulation / bf16 output rounding.
    x2d = x.reshape(x.shape[0], -1)
    w1, b1, w2, b2, w3, b3 = raw_params
    h1 = jnp.maximum(jnp.dot(x2d.astype(jnp.bfloat16), w1.astype(jnp.bfloat16),
                             preferred_element_type=jnp.float32) + b1, 0.0)
    h2 = jnp.maximum(jnp.dot(h1.astype(jnp.bfloat16), w2.astype(jnp.bfloat16),
                             preferred_element_type=jnp.float32) + b2, 0.0)
    ref = jax.nn.sigmoid(jnp.dot(h2.astype(jnp.bfloat16), w3.astype(jnp.bfloat16),
                                 preferred_element_type=jnp.float32) + b3)
    ref = ref.astype(jnp.bfloat16).astype(jnp.float32)

    out_f32 = out.astype(jnp.float32)
    assert out.shape == (2, attrs_num), out.shape
    assert out.dtype == jnp.bfloat16, out.dtype
    assert jnp.allclose(out_f32, ref, atol=1e-2, rtol=1e-2), float(jnp.max(jnp.abs(out_f32 - ref)))

    print("KERNEL_OK")
</pallas_src>

<mosaic_0001>
module attributes {stable_mosaic.version = 11 : i64} {
  func.func @_mlp_head_kernel(%arg0: i32, %arg1: memref<2x512xf32, #tpu.memory_space<vmem>>, %arg2: memref<512x512xbf16, #tpu.memory_space<vmem>>, %arg3: memref<1x512xf32, #tpu.memory_space<vmem>>, %arg4: memref<512x128xbf16, #tpu.memory_space<vmem>>, %arg5: memref<1x128xf32, #tpu.memory_space<vmem>>, %arg6: memref<128x128xbf16, #tpu.memory_space<vmem>>, %arg7: memref<1x128xf32, #tpu.memory_space<vmem>>, %arg8: memref<2x128xbf16, #tpu.memory_space<vmem>>) attributes {dimension_semantics = [#tpu.dimension_semantics<parallel>], iteration_bounds = array<i64: 1>, scalar_prefetch = 0 : i64, scratch_operands = 0 : i64, tpu.core_type = #tpu.core_type<tc>, window_params = [{transform_indices = @transform_0, window_bounds = array<i64: 2, 512>}, {pipeline_mode = #tpu.pipeline_mode<synchronous>, transform_indices = @transform_1, window_bounds = array<i64: 512, 512>}, {pipeline_mode = #tpu.pipeline_mode<synchronous>, transform_indices = @transform_2, window_bounds = array<i64: 1, 512>}, {pipeline_mode = #tpu.pipeline_mode<synchronous>, transform_indices = @transform_3, window_bounds = array<i64: 512, 128>}, {pipeline_mode = #tpu.pipeline_mode<synchronous>, transform_indices = @transform_4, window_bounds = array<i64: 1, 128>}, {pipeline_mode = #tpu.pipeline_mode<synchronous>, transform_indices = @transform_5, window_bounds = array<i64: 128, 128>}, {pipeline_mode = #tpu.pipeline_mode<synchronous>, transform_indices = @transform_6, window_bounds = array<i64: 1, 128>}, {transform_indices = @transform_7, window_bounds = array<i64: 2, 128>}]} {
    %c0 = arith.constant 0 : index
    %c0_0 = arith.constant 0 : index
    %0 = vector.load %arg1[%c0, %c0_0] : memref<2x512xf32, #tpu.memory_space<vmem>>, vector<2x512xf32>
    %1 = arith.truncf %0 : vector<2x512xf32> to vector<2x512xbf16>
    %c0_1 = arith.constant 0 : index
    %c0_2 = arith.constant 0 : index
    %2 = vector.load %arg2[%c0_1, %c0_2] : memref<512x512xbf16, #tpu.memory_space<vmem>>, vector<512x512xbf16>
    %cst = arith.constant dense<0.000000e+00> : vector<2x512xf32>
    %3 = tpu.matmul %1, %2, %cst {dimension_numbers = #tpu.dot_dimension_numbers<[1], [0], [0], [1], [0, 0, 1, 1], [], []>} : vector<2x512xbf16>, vector<512x512xbf16>, vector<2x512xf32> -> vector<2x512xf32>
    %c0_3 = arith.constant 0 : index
    %c0_4 = arith.constant 0 : index
    %4 = vector.load %arg3[%c0_3, %c0_4] : memref<1x512xf32, #tpu.memory_space<vmem>>, vector<1x512xf32>
    %5 = vector.broadcast %4 : vector<1x512xf32> to vector<2x512xf32>
    %6 = arith.addf %3, %5 : vector<2x512xf32>
    %cst_5 = arith.constant 0.000000e+00 : f32
    %7 = vector.broadcast %cst_5 : f32 to vector<2x512xf32>
    %8 = arith.maximumf %6, %7 : vector<2x512xf32>
    %9 = arith.truncf %8 : vector<2x512xf32> to vector<2x512xbf16>
    %c0_6 = arith.constant 0 : index
    %c0_7 = arith.constant 0 : index
    %10 = vector.load %arg4[%c0_6, %c0_7] : memref<512x128xbf16, #tpu.memory_space<vmem>>, vector<512x128xbf16>
    %cst_8 = arith.constant dense<0.000000e+00> : vector<2x128xf32>
    %11 = tpu.matmul %9, %10, %cst_8 {dimension_numbers = #tpu.dot_dimension_numbers<[1], [0], [0], [1], [0, 0, 1, 1], [], []>} : vector<2x512xbf16>, vector<512x128xbf16>, vector<2x128xf32> -> vector<2x128xf32>
    %c0_9 = arith.constant 0 : index
    %c0_10 = arith.constant 0 : index
    %12 = vector.load %arg5[%c0_9, %c0_10] : memref<1x128xf32, #tpu.memory_space<vmem>>, vector<1x128xf32>
    %13 = vector.broadcast %12 : vector<1x128xf32> to vector<2x128xf32>
    %14 = arith.addf %11, %13 : vector<2x128xf32>
    %cst_11 = arith.constant 0.000000e+00 : f32
    %15 = vector.broadcast %cst_11 : f32 to vector<2x128xf32>
    %16 = arith.maximumf %14, %15 : vector<2x128xf32>
    %17 = arith.truncf %16 : vector<2x128xf32> to vector<2x128xbf16>
    %c0_12 = arith.constant 0 : index
    %c0_13 = arith.constant 0 : index
    %18 = vector.load %arg6[%c0_12, %c0_13] : memref<128x128xbf16, #tpu.memory_space<vmem>>, vector<128x128xbf16>
    %cst_14 = arith.constant dense<0.000000e+00> : vector<2x128xf32>
    %19 = tpu.matmul %17, %18, %cst_14 {dimension_numbers = #tpu.dot_dimension_numbers<[1], [0], [0], [1], [0, 0, 1, 1], [], []>} : vector<2x128xbf16>, vector<128x128xbf16>, vector<2x128xf32> -> vector<2x128xf32>
    %c0_15 = arith.constant 0 : index
    %c0_16 = arith.constant 0 : index
    %20 = vector.load %arg7[%c0_15, %c0_16] : memref<1x128xf32, #tpu.memory_space<vmem>>, vector<1x128xf32>
    %21 = vector.broadcast %20 : vector<1x128xf32> to vector<2x128xf32>
    %22 = arith.addf %19, %21 : vector<2x128xf32>
    %23 = arith.negf %22 : vector<2x128xf32>
    %24 = math.exp %23 : vector<2x128xf32>
    %cst_17 = arith.constant 1.000000e+00 : f32
    %25 = vector.broadcast %cst_17 : f32 to vector<2x128xf32>
    %26 = arith.addf %25, %24 : vector<2x128xf32>
    %27 = arith.divf %25, %26 : vector<2x128xf32>
    %28 = arith.truncf %27 : vector<2x128xf32> to vector<2x128xbf16>
    %c0_18 = arith.constant 0 : index
    %c0_19 = arith.constant 0 : index
    %29 = vector.load %arg8[%c0_18, %c0_19] : memref<2x128xbf16, #tpu.memory_space<vmem>>, vector<2x128xbf16>
    tpu.vector_store %arg8[%c0_18, %c0_19], %28 {strides = array<i32>} : memref<2x128xbf16, #tpu.memory_space<vmem>>, vector<2x128xbf16>,
    return
  }
  func.func @transform_0(%arg0: i32) -> (i32, i32) {
    %c0_i32 = arith.constant 0 : i32
    %c0_i32_0 = arith.constant 0 : i32
    return %arg0, %c0_i32 : i32, i32
  }
  func.func @transform_1(%arg0: i32) -> (i32, i32) {
    %c0_i32 = arith.constant 0 : i32
    %c0_i32_0 = arith.constant 0 : i32
    %c0_i32_1 = arith.constant 0 : i32
    return %c0_i32, %c0_i32_0 : i32, i32
  }
  func.func @transform_2(%arg0: i32) -> (i32, i32) {
    %c0_i32 = arith.constant 0 : i32
    %c0_i32_0 = arith.constant 0 : i32
    %c0_i32_1 = arith.constant 0 : i32
    return %c0_i32, %c0_i32_0 : i32, i32
  }
  func.func @transform_3(%arg0: i32) -> (i32, i32) {
    %c0_i32 = arith.constant 0 : i32
    %c0_i32_0 = arith.constant 0 : i32
    %c0_i32_1 = arith.constant 0 : i32
    return %c0_i32, %c0_i32_0 : i32, i32
  }
  func.func @transform_4(%arg0: i32) -> (i32, i32) {
    %c0_i32 = arith.constant 0 : i32
    %c0_i32_0 = arith.constant 0 : i32
    %c0_i32_1 = arith.constant 0 : i32
    return %c0_i32, %c0_i32_0 : i32, i32
  }
  func.func @transform_5(%arg0: i32) -> (i32, i32) {
    %c0_i32 = arith.constant 0 : i32
    %c0_i32_0 = arith.constant 0 : i32
    %c0_i32_1 = arith.constant 0 : i32
    return %c0_i32, %c0_i32_0 : i32, i32
  }
  func.func @transform_6(%arg0: i32) -> (i32, i32) {
    %c0_i32 = arith.constant 0 : i32
    %c0_i32_0 = arith.constant 0 : i32
    %c0_i32_1 = arith.constant 0 : i32
    return %c0_i32, %c0_i32_0 : i32, i32
  }
  func.func @transform_7(%arg0: i32) -> (i32, i32) {
    %c0_i32 = arith.constant 0 : i32
    %c0_i32_0 = arith.constant 0 : i32
    return %arg0, %c0_i32 : i32, i32
  }
}

</mosaic_0001>

<bundles_post_ra>
// kernel: _head_forward.1
= control target key start
LH: loop header
LB: loop body
LE: loop exit
PB: predicated region body
PF: predicated region fallthrough
CT: control target
= control target key end

     0   :  { %12 = vsyncpa [#allocation3], 0  ;;  %s2576_s0 = inlined_call_operand.vmem [shape: f32[2,512], index: 0, kind: input, shape index: {}]   ;;  %s2577_s1 = inlined_call_operand.hbm [shape: bf16[512,512], index: 1, kind: input, shape index: {}]   ;;  %s2578_s2 = inlined_call_operand.vmem [shape: f32[1,512], index: 2, kind: input, shape index: {}]   ;;  %s2579_s3 = inlined_call_operand.hbm [shape: bf16[512,128], index: 3, kind: input, shape index: {}]   ;;  %s2580_s4 = inlined_call_operand.vmem [shape: f32[1,128], index: 4, kind: input, shape index: {}]   ;;  %s2581_s5 = inlined_call_operand.hbm [shape: bf16[128,128], index: 5, kind: input, shape index: {}]   ;;  %s2582_s6 = inlined_call_operand.vmem [shape: f32[1,128], index: 6, kind: input, shape index: {}]   ;;  %s2583_s7 = inlined_call_operand.hbm [shape: bf16[2,128], index: 7, kind: output, shape index: {}]  }
   0x1   :  { %13 = vsyncpa [#allocation6], 0  ;;  %s36_s26 = sshll.u32 %s2579_s3, 4  ;;  %s37_s26 = int_to_ptr.hbm [resolvable:$true] %s36_s26 }
   0x2   :  { %14 = vsyncpa [#allocation4], 0  ;;  %s2474_s27 = smov [#allocation5]   ;;  %s21_s8 = sshll.u32 %s2577_s1, 4  ;;  %s22_s8 = int_to_ptr.hbm [resolvable:$true] %s21_s8 }
   0x3   :  { %s38_s28 = sshll.u32 %s2474_s27, 4  ;;  %s2475_s9 = smov 64   ;;  %s39_s28 = int_to_ptr.vmem [resolvable:$true] %s38_s28 }
   0x4   :  { %s2476_s10 = smov 4   ;;  %s2477_s11 = smov [#allocation2]  }
   0x5   :  { %44 = dma.hbm_to_vmem [thread:$0]  %s37_s26, 4096, %s39_s28, [#allocation6], %s2475_s9, %s2475_s9, %s2476_s10  }
   0x6   :  { %s23_s12 = sshll.u32 %s2477_s11, 4  ;;  %s2478_s13 = smov 256   ;;  %s24_s12 = int_to_ptr.vmem [resolvable:$true] %s23_s12 }
   0x7   :  { %s2479_s14 = smov 16   ;;  %s51_s16 = sshll.u32 %s2581_s5, 4  ;;  %s52_s16 = int_to_ptr.hbm [resolvable:$true] %s51_s16 }
   0x8   :  { %29 = dma.hbm_to_vmem [thread:$0]  %s22_s8, 16384, %s24_s12, [#allocation3], %s2478_s13, %s2478_s13, %s2479_s14  }
   0x9   :  { %s2480_s17 = smov [#allocation7]  }
   0xa   :  { %s53_s18 = sshll.u32 %s2480_s17, 4  ;;  %s54_s18 = int_to_ptr.vmem [resolvable:$true] %s53_s18 }
   0xb   :  { %59 = dma.hbm_to_vmem [thread:$0]  %s52_s16, 1024, %s54_s18, [#allocation6], %s2475_s9, %s2475_s9, %s2476_s10  }
   0xc   :  { %2468 = dma.done.wait [#allocation3], 16384  }
   0xd   :  { %2469 = vsyncadd [#allocation3], 4294950912 }
   0xe   :  { %2470 = dma.done.wait [#allocation6], 5120  }
   0xf   :  { %2471 = vsyncadd [#allocation6], 4294962176  ;;  %v1631_v0 = vld [vmem:[#allocation2 + $0xe0] sm:$0xf]  ;;  %v2220_v1 = vld [vmem:[#allocation2 + $0xec] sm:$0xf0] }
  0x10   :  { %v1759_v2 = vld [vmem:[#allocation2 + $0x1e0] sm:$0xf]  ;;  %v1632_v3 = vor.u32 %v2220_v1, %v1631_v0  ;;  %v2252_v4 = vld [vmem:[#allocation2 + $0x1ec] sm:$0xf0]  ;;  %s1506_s25 = sshll.u32 %s2583_s7, 4  ;;  %s1507_s25 = int_to_ptr.hbm [resolvable:$true] %s1506_s25 }
  0x11   :  { %v1887_v5 = vld [vmem:[#allocation2 + $0x2e0] sm:$0xf]  ;;  %v2284_v6 = vld [vmem:[#allocation2 + $0x2ec] sm:$0xf0]  ;;  %v1760_v7 = vor.u32 %v2252_v4, %v1759_v2 }
  0x12   :  { %v1888_v8 = vor.u32 %v2284_v6, %v1887_v5  ;;  %v2015_v9 = vld [vmem:[#allocation2 + $0x3e0] sm:$0xf]  ;;  %v2316_v10 = vld [vmem:[#allocation2 + $0x3ec] sm:$0xf0]  ;;  %867 = vmatpush.bf16.msra.mxu0 %v1632_v3 }
  0x13   :  { %v1615_v11 = vld [vmem:[#allocation2 + $0xc0] sm:$0xf]  ;;  %v2016_v12 = vor.u32 %v2316_v10, %v2015_v9  ;;  %v2216_v13 = vld [vmem:[#allocation2 + $0xcc] sm:$0xf0]  ;;  %880 = vmatpush.bf16.msra.mxu1 %v1760_v7 }
  0x14   :  { %v1743_v14 = vld [vmem:[#allocation2 + $0x1c0] sm:$0xf]  ;;  %v2248_v15 = vld [vmem:[#allocation2 + $0x1cc] sm:$0xf0]  ;;  %893 = vmatpush.bf16.msra.mxu2 %v1888_v8  ;;  %v1616_v16 = vor.u32 %v2216_v13, %v1615_v11 }
  0x15   :  { %v1744_v17 = vor.u32 %v2248_v15, %v1743_v14  ;;  %v1871_v18 = vld [vmem:[#allocation2 + $0x2c0] sm:$0xf]  ;;  %v2280_v19 = vld [vmem:[#allocation2 + $0x2cc] sm:$0xf0]  ;;  %906 = vmatpush.bf16.msra.mxu3 %v2016_v12 }
  0x16   :  { %v1999_v20 = vld [vmem:[#allocation2 + $0x3c0] sm:$0xf]  ;;  %v1872_v21 = vor.u32 %v2280_v19, %v1871_v18  ;;  %v2312_v22 = vld [vmem:[#allocation2 + $0x3cc] sm:$0xf0]  ;;  %868 = vmatpush.bf16.msra.mxu0 %v1616_v16 }
  0x17   :  { %v1599_v23 = vld [vmem:[#allocation2 + $0xa0] sm:$0xf]  ;;  %v2212_v24 = vld [vmem:[#allocation2 + $0xac] sm:$0xf0]  ;;  %v2000_v25 = vor.u32 %v2312_v22, %v1999_v20  ;;  %881 = vmatpush.bf16.msra.mxu1 %v1744_v17 }
  0x18   :  { %v1727_v26 = vld [vmem:[#allocation2 + $0x1a0] sm:$0xf]  ;;  %v2244_v27 = vld [vmem:[#allocation2 + $0x1ac] sm:$0xf0]  ;;  %v1600_v29 = vor.u32 %v2212_v24, %v1599_v23  ;;  %894 = vmatpush.bf16.msra.mxu2 %v1872_v21 }
  0x19   :  { %v1855_v28 = vld [vmem:[#allocation2 + $0x2a0] sm:$0xf]  ;;  %v2276_v30 = vld [vmem:[#allocation2 + $0x2ac] sm:$0xf0]  ;;  %v1728_v33 = vor.u32 %v2244_v27, %v1727_v26  ;;  %907 = vmatpush.bf16.msra.mxu3 %v2000_v25 }
  0x1a   :  { %v1983_v31 = vld [vmem:[#allocation2 + $0x3a0] sm:$0xf]  ;;  %v2308_v32 = vld [vmem:[#allocation2 + $0x3ac] sm:$0xf0]  ;;  %v1856_v34 = vor.u32 %v2276_v30, %v1855_v28  ;;  %869 = vmatpush.bf16.msra.mxu0 %v1600_v29  ;;  %v2218_v28 = vld [vmem:[#allocation2 + $0xe4] sm:$0xf] }
  0x1b   :  { %v1583_v35 = vld [vmem:[#allocation2 + $0x80] sm:$0xf]  ;;  %v2208_v36 = vld [vmem:[#allocation2 + $0x8c] sm:$0xf0]  ;;  %v1984_v38 = vor.u32 %v2308_v32, %v1983_v31  ;;  %882 = vmatpush.bf16.msra.mxu1 %v1728_v33  ;;  %v1633_v29 = vld [vmem:[#allocation2 + $0xf0] sm:$0xf0] }
  0x1c   :  { %v1711_v37 = vld [vmem:[#allocation2 + $0x180] sm:$0xf]  ;;  %v2240_v39 = vld [vmem:[#allocation2 + $0x18c] sm:$0xf0]  ;;  %v1584_v44 = vor.u32 %v2208_v36, %v1583_v35  ;;  %895 = vmatpush.bf16.msra.mxu2 %v1856_v34  ;;  %v2250_v30 = vld [vmem:[#allocation2 + $0x1e4] sm:$0xf] }
  0x1d   :  { %v1839_v40 = vld [vmem:[#allocation2 + $0x280] sm:$0xf]  ;;  %v2272_v41 = vld [vmem:[#allocation2 + $0x28c] sm:$0xf0]  ;;  %v1712_v45 = vor.u32 %v2240_v39, %v1711_v37  ;;  %908 = vmatpush.bf16.msra.mxu3 %v1984_v38  ;;  %v1761_v32 = vld [vmem:[#allocation2 + $0x1f0] sm:$0xf0] }
  0x1e   :  { %v1967_v42 = vld [vmem:[#allocation2 + $0x380] sm:$0xf]  ;;  %v2304_v43 = vld [vmem:[#allocation2 + $0x38c] sm:$0xf0]  ;;  %v1840_v46 = vor.u32 %v2272_v41, %v1839_v40  ;;  %870 = vmatpush.bf16.msra.mxu0 %v1584_v44  ;;  %v2282_v33 = vld [vmem:[#allocation2 + $0x2e4] sm:$0xf]  ;;  %v1636_v40 = vor.u32 %v2218_v28, %v1633_v29  ;;  %v1764_v41 = vor.u32 %v2250_v30, %v1761_v32 }
  0x1f   :  { %v1567_v47 = vld [vmem:[#allocation2 + $0x60] sm:$0xf]  ;;  %v2204_v48 = vld [vmem:[#allocation2 + $0x6c] sm:$0xf0]  ;;  %v1968_v50 = vor.u32 %v2304_v43, %v1967_v42  ;;  %883 = vmatpush.bf16.msra.mxu1 %v1712_v45  ;;  %v1889_v34 = vld [vmem:[#allocation2 + $0x2f0] sm:$0xf0] }
  0x20   :  { %v1695_v49 = vld [vmem:[#allocation2 + $0x160] sm:$0xf]  ;;  %v2236_v51 = vld [vmem:[#allocation2 + $0x16c] sm:$0xf0]  ;;  %v1568_v56 = vor.u32 %v2204_v48, %v1567_v47  ;;  %896 = vmatpush.bf16.msra.mxu2 %v1840_v46  ;;  %v2314_v37 = vld [vmem:[#allocation2 + $0x3e4] sm:$0xf]  ;;  %v1892_v42 = vor.u32 %v2282_v33, %v1889_v34 }
  0x21   :  { %v1823_v52 = vld [vmem:[#allocation2 + $0x260] sm:$0xf]  ;;  %v2268_v53 = vld [vmem:[#allocation2 + $0x26c] sm:$0xf0]  ;;  %v1696_v57 = vor.u32 %v2236_v51, %v1695_v49  ;;  %909 = vmatpush.bf16.msra.mxu3 %v1968_v50  ;;  %v2017_v38 = vld [vmem:[#allocation2 + $0x3f0] sm:$0xf0] }
  0x22   :  { %v1951_v54 = vld [vmem:[#allocation2 + $0x360] sm:$0xf]  ;;  %v2300_v55 = vld [vmem:[#allocation2 + $0x36c] sm:$0xf0]  ;;  %v1824_v58 = vor.u32 %v2268_v53, %v1823_v52  ;;  %871 = vmatpush.bf16.msra.mxu0 %v1568_v56  ;;  %v2214_v43 = vld [vmem:[#allocation2 + $0xc4] sm:$0xf]  ;;  %v2020_v46 = vor.u32 %v2314_v37, %v2017_v38 }
  0x23   :  { %v1551_v59 = vld [vmem:[#allocation2 + $0x40] sm:$0xf]  ;;  %v2200_v60 = vld [vmem:[#allocation2 + $0x4c] sm:$0xf0]  ;;  %v1952_v62 = vor.u32 %v2300_v55, %v1951_v54  ;;  %884 = vmatpush.bf16.msra.mxu1 %v1696_v57  ;;  %v1617_v44 = vld [vmem:[#allocation2 + $0xd0] sm:$0xf0] }
  0x24   :  { %v1679_v61 = vld [vmem:[#allocation2 + $0x140] sm:$0xf]  ;;  %v2232_v63 = vld [vmem:[#allocation2 + $0x14c] sm:$0xf0]  ;;  %v1552_v4 = vor.u32 %v2200_v60, %v1551_v59  ;;  %897 = vmatpush.bf16.msra.mxu2 %v1824_v58  ;;  %v2246_v45 = vld [vmem:[#allocation2 + $0x1c4] sm:$0xf]  ;;  %v1620_v53 = vor.u32 %v2214_v43, %v1617_v44 }
  0x25   :  { %v1807_v0 = vld [vmem:[#allocation2 + $0x240] sm:$0xf]  ;;  %v2264_v1 = vld [vmem:[#allocation2 + $0x24c] sm:$0xf0]  ;;  %v1680_v5 = vor.u32 %v2232_v63, %v1679_v61  ;;  %910 = vmatpush.bf16.msra.mxu3 %v1952_v62  ;;  %v1745_v47 = vld [vmem:[#allocation2 + $0x1d0] sm:$0xf0] }
  0x26   :  { %v1935_v2 = vld [vmem:[#allocation2 + $0x340] sm:$0xf]  ;;  %v2296_v3 = vld [vmem:[#allocation2 + $0x34c] sm:$0xf0]  ;;  %v1808_v6 = vor.u32 %v2264_v1, %v1807_v0  ;;  %872 = vmatpush.bf16.msra.mxu0 %v1552_v4  ;;  %v2278_v48 = vld [vmem:[#allocation2 + $0x2c4] sm:$0xf]  ;;  %v1748_v54 = vor.u32 %v2246_v45, %v1745_v47 }
  0x27   :  { %v1535_v7 = vld [vmem:[#allocation2 + $0x20] sm:$0xf]  ;;  %v2196_v8 = vld [vmem:[#allocation2 + $0x2c] sm:$0xf0]  ;;  %v1936_v10 = vor.u32 %v2296_v3, %v1935_v2  ;;  %885 = vmatpush.bf16.msra.mxu1 %v1680_v5  ;;  %v1873_v49 = vld [vmem:[#allocation2 + $0x2d0] sm:$0xf0] }
  0x28   :  { %v1663_v9 = vld [vmem:[#allocation2 + $0x120] sm:$0xf]  ;;  %v2228_v11 = vld [vmem:[#allocation2 + $0x12c] sm:$0xf0]  ;;  %v1536_v16 = vor.u32 %v2196_v8, %v1535_v7  ;;  %898 = vmatpush.bf16.msra.mxu2 %v1808_v6  ;;  %v2310_v50 = vld [vmem:[#allocation2 + $0x3c4] sm:$0xf]  ;;  %v1876_v55 = vor.u32 %v2278_v48, %v1873_v49 }
  0x29   :  { %v1791_v12 = vld [vmem:[#allocation2 + $0x220] sm:$0xf]  ;;  %v2260_v13 = vld [vmem:[#allocation2 + $0x22c] sm:$0xf0]  ;;  %v1664_v19 = vor.u32 %v2228_v11, %v1663_v9  ;;  %911 = vmatpush.bf16.msra.mxu3 %v1936_v10  ;;  %v2001_v51 = vld [vmem:[#allocation2 + $0x3d0] sm:$0xf0] }
  0x2a   :  { %v1919_v14 = vld [vmem:[#allocation2 + $0x320] sm:$0xf]  ;;  %v2292_v15 = vld [vmem:[#allocation2 + $0x32c] sm:$0xf0]  ;;  %v1792_v20 = vor.u32 %v2260_v13, %v1791_v12  ;;  %873 = vmatpush.bf16.msra.mxu0 %v1536_v16  ;;  %v74_v52 = vld [vmem:[%s2576_s0] sm:$0xff]  ;;  %v2004_v59 = vor.u32 %v2310_v50, %v2001_v51 }
  0x2b   :  { %v1519_v17 = vld [vmem:[#allocation2] sm:$0xf]  ;;  %v2192_v18 = vld [vmem:[#allocation2 + $0xc] sm:$0xf0]  ;;  %v1920_v24 = vor.u32 %v2292_v15, %v1919_v14  ;;  %886 = vmatpush.bf16.msra.mxu1 %v1664_v19  ;;  %76 = vst [vmem:[#allocation1] ss:$4 sm:$0xff] %v74_v52 }
  0x2c   :  { %v1647_v21 = vld [vmem:[#allocation2 + $0x100] sm:$0xf]  ;;  %v2224_v22 = vld [vmem:[#allocation2 + $0x10c] sm:$0xf0]  ;;  %v1520_v31 = vor.u32 %v2192_v18, %v1519_v17  ;;  %899 = vmatpush.bf16.msra.mxu2 %v1792_v20  ;;  %v2210_v56 = vld [vmem:[#allocation2 + $0xa4] sm:$0xf] }
  0x2d   :  { %v1775_v23 = vld [vmem:[#allocation2 + $0x200] sm:$0xf]  ;;  %v2256_v25 = vld [vmem:[#allocation2 + $0x20c] sm:$0xf0]  ;;  %v1648_v35 = vor.u32 %v2224_v22, %v1647_v21  ;;  %912 = vmatpush.bf16.msra.mxu3 %v1920_v24  ;;  %v1601_v57 = vld [vmem:[#allocation2 + $0xb0] sm:$0xf0] }
  0x2e   :  { %v1903_v26 = vld [vmem:[#allocation2 + $0x300] sm:$0xf]  ;;  %v2288_v27 = vld [vmem:[#allocation2 + $0x30c] sm:$0xf0]  ;;  %v1776_v36 = vor.u32 %v2256_v25, %v1775_v23  ;;  %874 = vmatpush.bf16.msra.mxu0 %v1520_v31  ;;  %v2242_v58 = vld [vmem:[#allocation2 + $0x1a4] sm:$0xf]  ;;  %v1604_v1 = vor.u32 %v2210_v56, %v1601_v57 }
  0x2f   :  { %v1904_v39 = vor.u32 %v2288_v27, %v1903_v26  ;;  %887 = vmatpush.bf16.msra.mxu1 %v1648_v35  ;;  %v1729_v60 = vld [vmem:[#allocation2 + $0x1b0] sm:$0xf0]  ;;  %v2274_v61 = vld [vmem:[#allocation2 + $0x2a4] sm:$0xf] }
  0x30   :  { %900 = vmatpush.bf16.msra.mxu2 %v1776_v36  ;;  %v1857_v62 = vld [vmem:[#allocation2 + $0x2b0] sm:$0xf0]  ;;  %v2306_v63 = vld [vmem:[#allocation2 + $0x3a4] sm:$0xf]  ;;  %v1732_v4 = vor.u32 %v2242_v58, %v1729_v60 }
  0x31   :  { %913 = vmatpush.bf16.msra.mxu3 %v1904_v39  ;;  %v1985_v0 = vld [vmem:[#allocation2 + $0x3b0] sm:$0xf0]  ;;  %v2206_v2 = vld [vmem:[#allocation2 + $0x84] sm:$0xf]  ;;  %v1860_v5 = vor.u32 %v2274_v61, %v1857_v62 }
  0x32   :  { %919 = vmatpush.bf16.msrb.mxu0 %v1636_v40  ;;  %v1585_v3 = vld [vmem:[#allocation2 + $0x90] sm:$0xf0]  ;;  %v2238_v6 = vld [vmem:[#allocation2 + $0x184] sm:$0xf]  ;;  %v1988_v9 = vor.u32 %v2306_v63, %v1985_v0 }
  0x33   :  { %932 = vmatpush.bf16.msrb.mxu1 %v1764_v41  ;;  %v1713_v7 = vld [vmem:[#allocation2 + $0x190] sm:$0xf0]  ;;  %v2270_v8 = vld [vmem:[#allocation2 + $0x284] sm:$0xf]  ;;  %v1588_v15 = vor.u32 %v2206_v2, %v1585_v3 }
  0x34   :  { %945 = vmatpush.bf16.msrb.mxu2 %v1892_v42  ;;  %v1841_v10 = vld [vmem:[#allocation2 + $0x290] sm:$0xf0]  ;;  %v2302_v11 = vld [vmem:[#allocation2 + $0x384] sm:$0xf]  ;;  %v1716_v16 = vor.u32 %v2238_v6, %v1713_v7  ;;  %v2221_v6 = vld [vmem:[#allocation2 + $0xf4] sm:$0xf0] }
  0x35   :  { %958 = vmatpush.bf16.msrb.mxu3 %v2020_v46  ;;  %v1969_v12 = vld [vmem:[#allocation2 + $0x390] sm:$0xf0]  ;;  %v79_v13 = vld.sshfl [vmem:[#allocation1 + $0x10] sm:$0xff pattern:$0x73625140]  ;;  %v1844_v21 = vor.u32 %v2270_v8, %v1841_v10 }
  0x36   :  { %920 = vmatpush.bf16.msrb.mxu0 %v1620_v53  ;;  %v77_v14 = vld.sshfl [vmem:[#allocation1] sm:$0xff pattern:$0x73625140]  ;;  %v2534_v17 = vpack.c.bf16 %v79_v13, %v79_v13  ;;  %v80_v19 = vld.sshfl [vmem:[#allocation1 + $0x18] sm:$0xff pattern:$0x73625140]  ;;  %v1972_v27 = vor.u32 %v2302_v11, %v1969_v12 }
  0x37   :  { %933 = vmatpush.bf16.msrb.mxu1 %v1748_v54  ;;  %v2536_v18 = vpack.c.bf16 %v77_v14, %v77_v14  ;;  %v78_v20 = vld.sshfl [vmem:[#allocation1 + $0x8] sm:$0xff pattern:$0x73625140]  ;;  %v1569_v23 = vld [vmem:[#allocation2 + $0x70] sm:$0xf0]  ;;  %v2538_v25 = vpack.c.bf16 %v80_v19, %v80_v19 }
  0x38   :  { %946 = vmatpush.bf16.msrb.mxu2 %v1876_v55  ;;  %v2202_v22 = vld [vmem:[#allocation2 + $0x64] sm:$0xf]  ;;  %v2540_v26 = vpack.c.bf16 %v78_v20, %v78_v20  ;;  %v1697_v28 = vld [vmem:[#allocation2 + $0x170] sm:$0xf0]  ;;  %v1767_v7 = vld [vmem:[#allocation2 + $0x1e8] sm:$0xf] }
  0x39   :  { %959 = vmatpush.bf16.msrb.mxu3 %v2004_v59  ;;  %v2234_v24 = vld [vmem:[#allocation2 + $0x164] sm:$0xf]  ;;  %901 = vmatmul.bf16.vlgmr.msra.gmra.mxu2 %v2534_v17  ;;  %v1825_v30 = vld [vmem:[#allocation2 + $0x270] sm:$0xf0]  ;;  %v1572_v33 = vor.u32 %v2202_v22, %v1569_v23  ;;  %v1895_v10 = vld [vmem:[#allocation2 + $0x2e8] sm:$0xf] }
  0x3a   :  { %921 = vmatpush.bf16.msrb.mxu0 %v1604_v1  ;;  %v2266_v29 = vld [vmem:[#allocation2 + $0x264] sm:$0xf]  ;;  %v1953_v32 = vld [vmem:[#allocation2 + $0x370] sm:$0xf0]  ;;  %914 = vmatmul.bf16.vlgmr.msra.gmra.mxu3 %v2538_v25  ;;  %v1700_v34 = vor.u32 %v2234_v24, %v1697_v28  ;;  %v2285_v11 = vld [vmem:[#allocation2 + $0x2f4] sm:$0xf0] }
  0x3b   :  { %934 = vmatpush.bf16.msrb.mxu1 %v1732_v4  ;;  %v2298_v31 = vld [vmem:[#allocation2 + $0x364] sm:$0xf]  ;;  %875 = vmatmul.bf16.vlgmr.msra.gmra.mxu0 %v2536_v18  ;;  %v1828_v35 = vor.u32 %v2266_v29, %v1825_v30  ;;  %v1553_v37 = vld [vmem:[#allocation2 + $0x50] sm:$0xf0]  ;;  %v2023_v14 = vld [vmem:[#allocation2 + $0x3e8] sm:$0xf] }
  0x3c   :  { %947 = vmatpush.bf16.msrb.mxu2 %v1860_v5  ;;  %888 = vmatmul.bf16.vlgmr.msra.gmra.mxu1 %v2540_v26  ;;  %v2198_v36 = vld [vmem:[#allocation2 + $0x44] sm:$0xf]  ;;  %v1956_v39 = vor.u32 %v2298_v31, %v1953_v32  ;;  %v1681_v40 = vld [vmem:[#allocation2 + $0x150] sm:$0xf0]  ;;  %v1639_v5 = vld [vmem:[#allocation2 + $0xe8] sm:$0xf] }
  0x3d   :  { %960 = vmatpush.bf16.msrb.mxu3 %v1988_v9  ;;  %v2230_v38 = vld [vmem:[#allocation2 + $0x144] sm:$0xf]  ;;  %v1809_v42 = vld [vmem:[#allocation2 + $0x250] sm:$0xf0]  ;;  %v1556_v45 = vor.u32 %v2198_v36, %v1553_v37  ;;  %v2253_v9 = vld [vmem:[#allocation2 + $0x1f4] sm:$0xf0]  ;;  %v1640_v19 = vor.u32 %v2221_v6, %v1639_v5 }
  0x3e   :  { %922 = vmatpush.bf16.msrb.mxu0 %v1588_v15  ;;  %v2262_v41 = vld [vmem:[#allocation2 + $0x244] sm:$0xf]  ;;  %v1937_v44 = vld [vmem:[#allocation2 + $0x350] sm:$0xf0]  ;;  %v1684_v46 = vor.u32 %v2230_v38, %v1681_v40  ;;  %v2317_v15 = vld [vmem:[#allocation2 + $0x3f4] sm:$0xf0]  ;;  %v1768_v20 = vor.u32 %v2253_v9, %v1767_v7 }
  0x3f   :  { %935 = vmatpush.bf16.msrb.mxu1 %v1716_v16  ;;  %v2294_v43 = vld [vmem:[#allocation2 + $0x344] sm:$0xf]  ;;  %v1812_v47 = vor.u32 %v2262_v41, %v1809_v42  ;;  %v1537_v49 = vld [vmem:[#allocation2 + $0x30] sm:$0xf0]  ;;  %v1623_v22 = vld [vmem:[#allocation2 + $0xc8] sm:$0xf] }
  0x40   :  { %948 = vmatpush.bf16.msrb.mxu2 %v1844_v21  ;;  %v2194_v48 = vld [vmem:[#allocation2 + $0x24] sm:$0xf]  ;;  %v1940_v51 = vor.u32 %v2294_v43, %v1937_v44  ;;  %v1665_v52 = vld [vmem:[#allocation2 + $0x130] sm:$0xf0]  ;;  %v1896_v21 = vor.u32 %v2285_v11, %v1895_v10  ;;  %v2217_v23 = vld [vmem:[#allocation2 + $0xd4] sm:$0xf0] }
  0x41   :  { %961 = vmatpush.bf16.msrb.mxu3 %v1972_v27  ;;  %v2226_v50 = vld [vmem:[#allocation2 + $0x124] sm:$0xf]  ;;  %v1793_v54 = vld [vmem:[#allocation2 + $0x230] sm:$0xf0]  ;;  %v1540_v57 = vor.u32 %v2194_v48, %v1537_v49  ;;  %v1751_v24 = vld [vmem:[#allocation2 + $0x1c8] sm:$0xf]  ;;  %v2024_v27 = vor.u32 %v2317_v15, %v2023_v14 }
  0x42   :  { %923 = vmatpush.bf16.msrb.mxu0 %v1572_v33  ;;  %v2258_v53 = vld [vmem:[#allocation2 + $0x224] sm:$0xf]  ;;  %v1921_v56 = vld [vmem:[#allocation2 + $0x330] sm:$0xf0]  ;;  %v1668_v60 = vor.u32 %v2226_v50, %v1665_v52  ;;  %v2249_v28 = vld [vmem:[#allocation2 + $0x1d4] sm:$0xf0]  ;;  %v1624_v33 = vor.u32 %v2217_v23, %v1623_v22 }
  0x43   :  { %936 = vmatpush.bf16.msrb.mxu1 %v1700_v34  ;;  %v2290_v55 = vld [vmem:[#allocation2 + $0x324] sm:$0xf]  ;;  %v1521_v59 = vld [vmem:[#allocation2 + $0x10] sm:$0xf0]  ;;  %v1796_v61 = vor.u32 %v2258_v53, %v1793_v54  ;;  %v1879_v29 = vld [vmem:[#allocation2 + $0x2c8] sm:$0xf]  ;;  %v1752_v34 = vor.u32 %v2249_v28, %v1751_v24 }
  0x44   :  { %949 = vmatpush.bf16.msrb.mxu2 %v1828_v35  ;;  %v2190_v58 = vld [vmem:[#allocation2 + $0x4] sm:$0xf]  ;;  %v1649_v63 = vld [vmem:[#allocation2 + $0x110] sm:$0xf0]  ;;  %v1924_v1 = vor.u32 %v2290_v55, %v1921_v56  ;;  %v2281_v30 = vld [vmem:[#allocation2 + $0x2d4] sm:$0xf0] }
  0x45   :  { %962 = vmatpush.bf16.msrb.mxu3 %v1956_v39  ;;  %v2222_v62 = vld [vmem:[#allocation2 + $0x104] sm:$0xf]  ;;  %v1777_v2 = vld [vmem:[#allocation2 + $0x210] sm:$0xf0]  ;;  %v1524_v8 = vor.u32 %v2190_v58, %v1521_v59  ;;  %v2007_v31 = vld [vmem:[#allocation2 + $0x3c8] sm:$0xf]  ;;  %v1880_v35 = vor.u32 %v2281_v30, %v1879_v29 }
  0x46   :  { %924 = vmatpush.bf16.msrb.mxu0 %v1556_v45  ;;  %v2254_v0 = vld [vmem:[#allocation2 + $0x204] sm:$0xf]  ;;  %v1905_v4 = vld [vmem:[#allocation2 + $0x310] sm:$0xf0]  ;;  %v1652_v12 = vor.u32 %v2222_v62, %v1649_v63  ;;  %v2313_v32 = vld [vmem:[#allocation2 + $0x3d4] sm:$0xf0] }
  0x47   :  { %937 = vmatpush.bf16.msrb.mxu1 %v1684_v46  ;;  %v2286_v3 = vld [vmem:[#allocation2 + $0x304] sm:$0xf]  ;;  %v1780_v13 = vor.u32 %v2254_v0, %v1777_v2  ;;  %v1607_v36 = vld [vmem:[#allocation2 + $0xa8] sm:$0xf]  ;;  %v2213_v37 = vld [vmem:[#allocation2 + $0xb4] sm:$0xf0]  ;;  %v2008_v39 = vor.u32 %v2313_v32, %v2007_v31 }
  0x48   :  { %950 = vmatpush.bf16.msrb.mxu2 %v1812_v47  ;;  %v1908_v16 = vor.u32 %v2286_v3, %v1905_v4  ;;  %v1735_v38 = vld [vmem:[#allocation2 + $0x1a8] sm:$0xf]  ;;  %v2245_v40 = vld [vmem:[#allocation2 + $0x1b4] sm:$0xf0]  ;;  %v1608_v45 = vor.u32 %v2213_v37, %v1607_v36 }
  0x49   :  { %963 = vmatpush.bf16.msrb.mxu3 %v1940_v51  ;;  %v1863_v41 = vld [vmem:[#allocation2 + $0x2a8] sm:$0xf]  ;;  %v2277_v42 = vld [vmem:[#allocation2 + $0x2b4] sm:$0xf0]  ;;  %v1736_v46 = vor.u32 %v2245_v40, %v1735_v38 }
  0x4a   :  { %925 = vmatpush.bf16.msrb.mxu0 %v1540_v57  ;;  %v1991_v43 = vld [vmem:[#allocation2 + $0x3a8] sm:$0xf]  ;;  %v2309_v44 = vld [vmem:[#allocation2 + $0x3b4] sm:$0xf0]  ;;  %v1864_v47 = vor.u32 %v2277_v42, %v1863_v41 }
  0x4b   :  { %938 = vmatpush.bf16.msrb.mxu1 %v1668_v60  ;;  %v1591_v48 = vld [vmem:[#allocation2 + $0x88] sm:$0xf]  ;;  %v2209_v49 = vld [vmem:[#allocation2 + $0x94] sm:$0xf0]  ;;  %v1992_v51 = vor.u32 %v2309_v44, %v1991_v43 }
  0x4c   :  { %951 = vmatpush.bf16.msrb.mxu2 %v1796_v61  ;;  %v1719_v50 = vld [vmem:[#allocation2 + $0x188] sm:$0xf]  ;;  %v2241_v52 = vld [vmem:[#allocation2 + $0x194] sm:$0xf0]  ;;  %v1592_v57 = vor.u32 %v2209_v49, %v1591_v48  ;;  %v1769_v49 = vld [vmem:[#allocation2 + $0x1f8] sm:$0xf0] }
  0x4d   :  { %964 = vmatpush.bf16.msrb.mxu3 %v1924_v1  ;;  %v1847_v53 = vld [vmem:[#allocation2 + $0x288] sm:$0xf]  ;;  %v2273_v54 = vld [vmem:[#allocation2 + $0x294] sm:$0xf0]  ;;  %v1720_v58 = vor.u32 %v2241_v52, %v1719_v50  ;;  %v2283_v50 = vld [vmem:[#allocation2 + $0x2ec] sm:$0xf] }
  0x4e   :  { %926 = vmatpush.bf16.msrb.mxu0 %v1524_v8  ;;  %v1975_v55 = vld [vmem:[#allocation2 + $0x388] sm:$0xf]  ;;  %v2305_v56 = vld [vmem:[#allocation2 + $0x394] sm:$0xf0]  ;;  %v1848_v59 = vor.u32 %v2273_v54, %v1847_v53  ;;  %v2315_v54 = vld [vmem:[#allocation2 + $0x3ec] sm:$0xf] }
  0x4f   :  { %939 = vmatpush.bf16.msrb.mxu1 %v1652_v12  ;;  %v1575_v60 = vld [vmem:[#allocation2 + $0x68] sm:$0xf]  ;;  %v2205_v61 = vld [vmem:[#allocation2 + $0x74] sm:$0xf0]  ;;  %v1976_v63 = vor.u32 %v2305_v56, %v1975_v55  ;;  %v2025_v55 = vld [vmem:[#allocation2 + $0x3f8] sm:$0xf0] }
  0x50   :  { %952 = vmatpush.bf16.msrb.mxu2 %v1780_v13  ;;  %v1703_v62 = vld [vmem:[#allocation2 + $0x168] sm:$0xf]  ;;  %v2237_v0 = vld [vmem:[#allocation2 + $0x174] sm:$0xf0]  ;;  %v1576_v5 = vor.u32 %v2205_v61, %v1575_v60  ;;  %v2215_v60 = vld [vmem:[#allocation2 + $0xcc] sm:$0xf] }
  0x51   :  { %965 = vmatpush.bf16.msrb.mxu3 %v1908_v16  ;;  %927 = vmatmul.bf16.vlgmr.msrb.gmra.mxu0 %v2536_v18  ;;  %v1831_v1 = vld [vmem:[#allocation2 + $0x268] sm:$0xf]  ;;  %v2269_v2 = vld [vmem:[#allocation2 + $0x274] sm:$0xf0]  ;;  %v1704_v6 = vor.u32 %v2237_v0, %v1703_v62  ;;  %v1625_v61 = vld [vmem:[#allocation2 + $0xd8] sm:$0xf0] }
  0x52   :  { %971 = vmatpush.bf16.msra.mxu0 %v1640_v19  ;;  %940 = vmatmul.bf16.vlgmr.msrb.gmra.mxu1 %v2540_v26  ;;  %v1959_v3 = vld [vmem:[#allocation2 + $0x368] sm:$0xf]  ;;  %v2301_v4 = vld [vmem:[#allocation2 + $0x374] sm:$0xf0]  ;;  %v1832_v7 = vor.u32 %v2269_v2, %v1831_v1  ;;  %v2247_v62 = vld [vmem:[#allocation2 + $0x1cc] sm:$0xf] }
  0x53   :  { %984 = vmatpush.bf16.msra.mxu1 %v1768_v20  ;;  %953 = vmatmul.bf16.vlgmr.msrb.gmra.mxu2 %v2534_v17  ;;  %v1559_v8 = vld [vmem:[#allocation2 + $0x48] sm:$0xf]  ;;  %v2201_v9 = vld [vmem:[#allocation2 + $0x54] sm:$0xf0]  ;;  %v1960_v11 = vor.u32 %v2301_v4, %v1959_v3  ;;  %v1753_v0 = vld [vmem:[#allocation2 + $0x1d8] sm:$0xf0] }
  0x54   :  { %997 = vmatpush.bf16.msra.mxu2 %v1896_v21  ;;  %966 = vmatmul.bf16.vlgmr.msrb.gmra.mxu3 %v2538_v25  ;;  %v1687_v10 = vld [vmem:[#allocation2 + $0x148] sm:$0xf]  ;;  %v2233_v12 = vld [vmem:[#allocation2 + $0x154] sm:$0xf0]  ;;  %v1560_v19 = vor.u32 %v2201_v9, %v1559_v8  ;;  %v2279_v1 = vld [vmem:[#allocation2 + $0x2cc] sm:$0xf] }
  0x55   :  { %1010 = vmatpush.bf16.msra.mxu3 %v2024_v27  ;;  %v1815_v13 = vld [vmem:[#allocation2 + $0x248] sm:$0xf]  ;;  %v2265_v14 = vld [vmem:[#allocation2 + $0x254] sm:$0xf0]  ;;  %v1688_v20 = vor.u32 %v2233_v12, %v1687_v10  ;;  %v1881_v2 = vld [vmem:[#allocation2 + $0x2d8] sm:$0xf0] }
  0x56   :  { %972 = vmatpush.bf16.msra.mxu0 %v1624_v33  ;;  %v1943_v15 = vld [vmem:[#allocation2 + $0x348] sm:$0xf]  ;;  %v2297_v16 = vld [vmem:[#allocation2 + $0x354] sm:$0xf0]  ;;  %v1816_v21 = vor.u32 %v2265_v14, %v1815_v13  ;;  %v2311_v3 = vld [vmem:[#allocation2 + $0x3cc] sm:$0xf] }
  0x57   :  { %985 = vmatpush.bf16.msra.mxu1 %v1752_v34  ;;  %v1543_v22 = vld [vmem:[#allocation2 + $0x28] sm:$0xf]  ;;  %v2197_v23 = vld [vmem:[#allocation2 + $0x34] sm:$0xf0]  ;;  %v1944_v27 = vor.u32 %v2297_v16, %v1943_v15  ;;  %v2009_v4 = vld [vmem:[#allocation2 + $0x3d8] sm:$0xf0] }
  0x58   :  { %998 = vmatpush.bf16.msra.mxu2 %v1880_v35  ;;  %v1671_v24 = vld [vmem:[#allocation2 + $0x128] sm:$0xf]  ;;  %v2229_v28 = vld [vmem:[#allocation2 + $0x134] sm:$0xf0]  ;;  %v1544_v33 = vor.u32 %v2197_v23, %v1543_v22  ;;  %v2211_v8 = vld [vmem:[#allocation2 + $0xac] sm:$0xf] }
  0x59   :  { %1011 = vmatpush.bf16.msra.mxu3 %v2008_v39  ;;  %v1799_v29 = vld [vmem:[#allocation2 + $0x228] sm:$0xf]  ;;  %v2261_v30 = vld [vmem:[#allocation2 + $0x234] sm:$0xf0]  ;;  %v1672_v36 = vor.u32 %v2229_v28, %v1671_v24  ;;  %v1609_v9 = vld [vmem:[#allocation2 + $0xb8] sm:$0xf0] }
  0x5a   :  { %973 = vmatpush.bf16.msra.mxu0 %v1608_v45  ;;  %v1927_v31 = vld [vmem:[#allocation2 + $0x328] sm:$0xf]  ;;  %v2293_v32 = vld [vmem:[#allocation2 + $0x334] sm:$0xf0]  ;;  %v1800_v37 = vor.u32 %v2261_v30, %v1799_v29  ;;  %v2219_v45 = vld [vmem:[#allocation2 + $0xec] sm:$0xf] }
  0x5b   :  { %986 = vmatpush.bf16.msra.mxu1 %v1736_v46  ;;  %v1527_v34 = vld [vmem:[#allocation2 + $0x8] sm:$0xf]  ;;  %v2193_v35 = vld [vmem:[#allocation2 + $0x14] sm:$0xf0]  ;;  %v1928_v41 = vor.u32 %v2293_v32, %v1927_v31  ;;  %v1641_v46 = vld [vmem:[#allocation2 + $0xf8] sm:$0xf0] }
  0x5c   :  { %999 = vmatpush.bf16.msra.mxu2 %v1864_v47  ;;  %v1655_v38 = vld [vmem:[#allocation2 + $0x108] sm:$0xf]  ;;  %v2225_v39 = vld [vmem:[#allocation2 + $0x114] sm:$0xf0]  ;;  %v2251_v47 = vld [vmem:[#allocation2 + $0x1ec] sm:$0xf]  ;;  %v1528_v48 = vor.u32 %v2193_v35, %v1527_v34 }
  0x5d   :  { %1012 = vmatpush.bf16.msra.mxu3 %v1992_v51  ;;  %v1783_v40 = vld [vmem:[#allocation2 + $0x208] sm:$0xf]  ;;  %v2257_v42 = vld [vmem:[#allocation2 + $0x214] sm:$0xf0]  ;;  %v1897_v51 = vld [vmem:[#allocation2 + $0x2f8] sm:$0xf0]  ;;  %v1656_v52 = vor.u32 %v2225_v39, %v1655_v38 }
  0x5e   :  { %974 = vmatpush.bf16.msra.mxu0 %v1592_v57  ;;  %v1911_v43 = vld [vmem:[#allocation2 + $0x308] sm:$0xf]  ;;  %v2289_v44 = vld [vmem:[#allocation2 + $0x314] sm:$0xf0]  ;;  %v1784_v53 = vor.u32 %v2257_v42, %v1783_v40  ;;  %v1644_v57 = vor.u32 %v2219_v45, %v1641_v46  ;;  %v2243_v10 = vld [vmem:[#allocation2 + $0x1ac] sm:$0xf] }
  0x5f   :  { %987 = vmatpush.bf16.msra.mxu1 %v1720_v58  ;;  %v1912_v56 = vor.u32 %v2289_v44, %v1911_v43  ;;  %v1772_v58 = vor.u32 %v2251_v47, %v1769_v49  ;;  %v1737_v12 = vld [vmem:[#allocation2 + $0x1b8] sm:$0xf0]  ;;  %v2275_v13 = vld [vmem:[#allocation2 + $0x2ac] sm:$0xf] }
  0x60   :  { %1000 = vmatpush.bf16.msra.mxu2 %v1848_v59  ;;  %v1900_v59 = vor.u32 %v2283_v50, %v1897_v51  ;;  %v1865_v14 = vld [vmem:[#allocation2 + $0x2b8] sm:$0xf0]  ;;  %v2307_v15 = vld [vmem:[#allocation2 + $0x3ac] sm:$0xf] }
  0x61   :  { %1013 = vmatpush.bf16.msra.mxu3 %v1976_v63  ;;  %v2028_v63 = vor.u32 %v2315_v54, %v2025_v55  ;;  %v1993_v16 = vld [vmem:[#allocation2 + $0x3b8] sm:$0xf0]  ;;  %v2207_v22 = vld [vmem:[#allocation2 + $0x8c] sm:$0xf] }
  0x62   :  { %975 = vmatpush.bf16.msra.mxu0 %v1576_v5  ;;  %v1628_v5 = vor.u32 %v2215_v60, %v1625_v61  ;;  %v1593_v23 = vld [vmem:[#allocation2 + $0x98] sm:$0xf0]  ;;  %v2239_v24 = vld [vmem:[#allocation2 + $0x18c] sm:$0xf] }
  0x63   :  { %988 = vmatpush.bf16.msra.mxu1 %v1704_v6  ;;  %v1756_v6 = vor.u32 %v2247_v62, %v1753_v0  ;;  %v1721_v28 = vld [vmem:[#allocation2 + $0x198] sm:$0xf0]  ;;  %v2271_v29 = vld [vmem:[#allocation2 + $0x28c] sm:$0xf] }
  0x64   :  { %1001 = vmatpush.bf16.msra.mxu2 %v1832_v7  ;;  %v1884_v7 = vor.u32 %v2279_v1, %v1881_v2  ;;  %v1849_v30 = vld [vmem:[#allocation2 + $0x298] sm:$0xf0]  ;;  %v2303_v31 = vld [vmem:[#allocation2 + $0x38c] sm:$0xf]  ;;  %v1724_v34 = vor.u32 %v2239_v24, %v1721_v28 }
  0x65   :  { %1014 = vmatpush.bf16.msra.mxu3 %v1960_v11  ;;  %v2012_v11 = vor.u32 %v2311_v3, %v2009_v4  ;;  %v1977_v32 = vld [vmem:[#allocation2 + $0x398] sm:$0xf0]  ;;  %v1852_v35 = vor.u32 %v2271_v29, %v1849_v30  ;;  %v2235_v38 = vld [vmem:[#allocation2 + $0x16c] sm:$0xf]  ;;  %v2322_v29 = vld [vmem:[#allocation5 + $0x20] sm:$0xff] }
  0x66   :  { %976 = vmatpush.bf16.msra.mxu0 %v1560_v19  ;;  %v1612_v19 = vor.u32 %v2211_v8, %v1609_v9  ;;  %v1980_v39 = vor.u32 %v2303_v31, %v1977_v32  ;;  %v1705_v40 = vld [vmem:[#allocation2 + $0x178] sm:$0xf0]  ;;  %v2299_v43 = vld [vmem:[#allocation2 + $0x36c] sm:$0xf]  ;;  %v2332_v30 = vld [vmem:[#allocation5 + $0x70] sm:$0xff] }
  0x67   :  { %989 = vmatpush.bf16.msra.mxu1 %v1688_v20  ;;  %v1740_v20 = vor.u32 %v2243_v10, %v1737_v12  ;;  %v1833_v42 = vld [vmem:[#allocation2 + $0x278] sm:$0xf0]  ;;  %v1708_v46 = vor.u32 %v2235_v38, %v1705_v40  ;;  %v2231_v50 = vld [vmem:[#allocation2 + $0x14c] sm:$0xf] }
  0x68   :  { %1002 = vmatpush.bf16.msra.mxu2 %v1816_v21  ;;  %v1868_v21 = vor.u32 %v2275_v13, %v1865_v14  ;;  %v1961_v44 = vld [vmem:[#allocation2 + $0x378] sm:$0xf0]  ;;  %v2295_v55 = vld [vmem:[#allocation2 + $0x34c] sm:$0xf] }
  0x69   :  { %1015 = vmatpush.bf16.msra.mxu3 %v1944_v27  ;;  %v1996_v27 = vor.u32 %v2307_v15, %v1993_v16  ;;  %v1561_v49 = vld [vmem:[#allocation2 + $0x58] sm:$0xf0]  ;;  %v1964_v51 = vor.u32 %v2299_v43, %v1961_v44  ;;  %v2195_v60 = vld [vmem:[#allocation2 + $0x2c] sm:$0xf]  ;;  %v2340_v44 = vld [vmem:[#allocation5 + $0xb0] sm:$0xff] }
  0x6a   :  { %977 = vmatpush.bf16.msra.mxu0 %v1544_v33  ;;  %v1596_v33 = vor.u32 %v2207_v22, %v1593_v23  ;;  %v1817_v54 = vld [vmem:[#allocation2 + $0x258] sm:$0xf0]  ;;  %v2227_v62 = vld [vmem:[#allocation2 + $0x12c] sm:$0xf] }
  0x6b   :  { %990 = vmatpush.bf16.msra.mxu1 %v1672_v36  ;;  %v2203_v36 = vld [vmem:[#allocation2 + $0x6c] sm:$0xf]  ;;  %v1545_v61 = vld [vmem:[#allocation2 + $0x38] sm:$0xf0] }
  0x6c   :  { %1003 = vmatpush.bf16.msra.mxu2 %v1800_v37  ;;  %v1577_v37 = vld [vmem:[#allocation2 + $0x78] sm:$0xf0]  ;;  %v2259_v1 = vld [vmem:[#allocation2 + $0x22c] sm:$0xf] }
  0x6d   :  { %1016 = vmatpush.bf16.msra.mxu3 %v1928_v41  ;;  %v2267_v41 = vld [vmem:[#allocation2 + $0x26c] sm:$0xf]  ;;  %v1580_v45 = vor.u32 %v2203_v36, %v1577_v37  ;;  %v1673_v0 = vld [vmem:[#allocation2 + $0x138] sm:$0xf0] }
  0x6e   :  { %978 = vmatpush.bf16.msra.mxu0 %v1528_v48  ;;  %v1836_v47 = vor.u32 %v2267_v41, %v1833_v42  ;;  %v2199_v48 = vld [vmem:[#allocation2 + $0x4c] sm:$0xf]  ;;  %v1801_v2 = vld [vmem:[#allocation2 + $0x238] sm:$0xf0]  ;;  %v2326_v41 = vld [vmem:[#allocation5 + $0x40] sm:$0xff] }
  0x6f   :  { %991 = vmatpush.bf16.msra.mxu1 %v1656_v52  ;;  %v1689_v52 = vld [vmem:[#allocation2 + $0x158] sm:$0xf0]  ;;  %v2291_v3 = vld [vmem:[#allocation2 + $0x32c] sm:$0xf] }
  0x70   :  { %1004 = vmatpush.bf16.msra.mxu2 %v1784_v53  ;;  %v2263_v53 = vld [vmem:[#allocation2 + $0x24c] sm:$0xf]  ;;  %v1929_v4 = vld [vmem:[#allocation2 + $0x338] sm:$0xf0] }
  0x71   :  { %1017 = vmatpush.bf16.msra.mxu3 %v1912_v56  ;;  %979 = vmatmul.bf16.vlgmr.msra.gmra.mxu0 %v2536_v18  ;;  %v1945_v56 = vld [vmem:[#allocation2 + $0x358] sm:$0xf0]  ;;  %v2191_v8 = vld [vmem:[#allocation2 + $0xc] sm:$0xf] }
  0x72   :  { %1023 = vmatpush.bf16.msrb.mxu0 %v1644_v57  ;;  %992 = vmatmul.bf16.vlgmr.msra.gmra.mxu1 %v2540_v26  ;;  %v1564_v57 = vor.u32 %v2199_v48, %v1561_v49  ;;  %v1529_v9 = vld [vmem:[#allocation2 + $0x18] sm:$0xf0]  ;;  %v2223_v10 = vld [vmem:[#allocation2 + $0x10c] sm:$0xf] }
  0x73   :  { %1036 = vmatpush.bf16.msrb.mxu1 %v1772_v58  ;;  %1005 = vmatmul.bf16.vlgmr.msra.gmra.mxu2 %v2534_v17  ;;  %v1692_v58 = vor.u32 %v2231_v50, %v1689_v52  ;;  %v1657_v12 = vld [vmem:[#allocation2 + $0x118] sm:$0xf0]  ;;  %v2255_v13 = vld [vmem:[#allocation2 + $0x20c] sm:$0xf] }
  0x74   :  { %1049 = vmatpush.bf16.msrb.mxu2 %v1900_v59  ;;  %1018 = vmatmul.bf16.vlgmr.msra.gmra.mxu3 %v2538_v25  ;;  %v1820_v59 = vor.u32 %v2263_v53, %v1817_v54  ;;  %v1785_v14 = vld [vmem:[#allocation2 + $0x218] sm:$0xf0]  ;;  %v2287_v15 = vld [vmem:[#allocation2 + $0x30c] sm:$0xf]  ;;  %v2338_v54 = vld [vmem:[#allocation5 + $0xa0] sm:$0xff] }
  0x75   :  { %1062 = vmatpush.bf16.msrb.mxu3 %v2028_v63  ;;  %v1948_v63 = vor.u32 %v2295_v55, %v1945_v56  ;;  %v1913_v16 = vld [vmem:[#allocation2 + $0x318] sm:$0xf0]  ;;  %v2323_v28 = vld [vmem:[#allocation5 + $0x28] sm:$0xff] }
  0x76   :  { %1024 = vmatpush.bf16.msrb.mxu0 %v1628_v5  ;;  %v1548_v5 = vor.u32 %v2195_v60, %v1545_v61  ;;  %v1916_v22 = vor.u32 %v2287_v15, %v1913_v16  ;;  %v2325_v23 = vld [vmem:[#allocation5 + $0x38] sm:$0xff]  ;;  %v2331_v32 = vld [vmem:[#allocation5 + $0x68] sm:$0xff]  ;;  %v2346_v15 = vld [vmem:[#allocation5 + $0xe0] sm:$0xff] }
  0x77   :  { %1037 = vmatpush.bf16.msrb.mxu1 %v1756_v6  ;;  %v1676_v6 = vor.u32 %v2227_v62, %v1673_v0  ;;  %v2333_v24 = vld [vmem:[#allocation5 + $0x78] sm:$0xff]  ;;  %v2327_v37 = vld [vmem:[#allocation5 + $0x48] sm:$0xff]  ;;  %v2336_v62 = vld [vmem:[#allocation5 + $0x90] sm:$0xff] }
  0x78   :  { %1050 = vmatpush.bf16.msrb.mxu2 %v1884_v7  ;;  %v1804_v7 = vor.u32 %v2259_v1, %v1801_v2  ;;  %v2321_v31 = vld [vmem:[#allocation5 + $0x18] sm:$0xff]  ;;  %v2339_v50 = vld [vmem:[#allocation5 + $0xa8] sm:$0xff] }
  0x79   :  { %1063 = vmatpush.bf16.msrb.mxu3 %v2012_v11  ;;  %v1932_v11 = vor.u32 %v2291_v3, %v1929_v4  ;;  %v2341_v42 = vld [vmem:[#allocation5 + $0xb8] sm:$0xff]  ;;  %v2335_v1 = vld [vmem:[#allocation5 + $0x88] sm:$0xff] }
  0x7a   :  { %1025 = vmatpush.bf16.msrb.mxu0 %v1612_v19  ;;  %v1532_v19 = vor.u32 %v2191_v8, %v1529_v9  ;;  %v2349_v9 = vld [vmem:[#allocation5 + $0xf8] sm:$0xff] }
  0x7b   :  { %1038 = vmatpush.bf16.msrb.mxu1 %v1740_v20  ;;  %v1660_v20 = vor.u32 %v2223_v10, %v1657_v12  ;;  %v2345_v16 = vld [vmem:[#allocation5 + $0xd8] sm:$0xff] }
  0x7c   :  { %1051 = vmatpush.bf16.msrb.mxu2 %v1868_v21  ;;  %v1788_v21 = vor.u32 %v2255_v13, %v1785_v14  ;;  %v2347_v14 = vld [vmem:[#allocation5 + $0xe8] sm:$0xff] }
  0x7d   :  { %1064 = vmatpush.bf16.msrb.mxu3 %v1996_v27  ;;  %v2324_v27 = vld [vmem:[#allocation5 + $0x30] sm:$0xff] }
  0x7e   :  { %1026 = vmatpush.bf16.msrb.mxu0 %v1596_v33  ;;  %v2320_v33 = vld [vmem:[#allocation5 + $0x10] sm:$0xff] }
  0x7f   :  { %1039 = vmatpush.bf16.msrb.mxu1 %v1724_v34  ;;  %v2319_v34 = vld [vmem:[#allocation5 + $0x8] sm:$0xff] }
  0x80   :  { %1052 = vmatpush.bf16.msrb.mxu2 %v1852_v35  ;;  %v2561_v35 = vld [vmem:[%s2578_s2] sm:$0xf] }
  0x81   :  { %1065 = vmatpush.bf16.msrb.mxu3 %v1980_v39  ;;  %v219_v36 = vperm.slane %v2561_v35, 0 }
  0x82   :  { %1027 = vmatpush.bf16.msrb.mxu0 %v1580_v45 }
  0x83   :  { %1040 = vmatpush.bf16.msrb.mxu1 %v1708_v46 }
  0x84   :  { %1053 = vmatpush.bf16.msrb.mxu2 %v1836_v47 }
  0x85   :  { %1066 = vmatpush.bf16.msrb.mxu3 %v1964_v51 }
  0x86   :  { %1028 = vmatpush.bf16.msrb.mxu0 %v1564_v57  ;;  %v2337_v57 = vld [vmem:[#allocation5 + $0x98] sm:$0xff] }
  0x87   :  { %1041 = vmatpush.bf16.msrb.mxu1 %v1692_v58  ;;  %v220_v58 = vperm.slane %v2561_v35, 1 }
  0x88   :  { %1054 = vmatpush.bf16.msrb.mxu2 %v1820_v59 }
  0x89   :  { %1067 = vmatpush.bf16.msrb.mxu3 %v1948_v63 }
  0x8a   :  { %1029 = vmatpush.bf16.msrb.mxu0 %v1548_v5 }
  0x8b   :  { %1042 = vmatpush.bf16.msrb.mxu1 %v1676_v6 }
  0x8c   :  { %1055 = vmatpush.bf16.msrb.mxu2 %v1804_v7  ;;  %v2334_v7 = vld [vmem:[#allocation5 + $0x80] sm:$0xff] }
  0x8d   :  { %1068 = vmatpush.bf16.msrb.mxu3 %v1932_v11  ;;  %v2348_v11 = vld [vmem:[#allocation5 + $0xf0] sm:$0xff] }
  0x8e   :  { %1030 = vmatpush.bf16.msrb.mxu0 %v1532_v19  ;;  %v221_v19 = vperm.slane %v2561_v35, 2 }
  0x8f   :  { %1043 = vmatpush.bf16.msrb.mxu1 %v1660_v20  ;;  %v2344_v20 = vld [vmem:[#allocation5 + $0xd0] sm:$0xff] }
  0x90   :  { %1056 = vmatpush.bf16.msrb.mxu2 %v1788_v21 }
  0x91   :  { %1069 = vmatpush.bf16.msrb.mxu3 %v1916_v22  ;;  %1031 = vmatmul.bf16.vlgmr.msrb.gmra.mxu0 %v2536_v18  ;;  %v2330_v18 = vld [vmem:[#allocation5 + $0x60] sm:$0xff] }
  0x92   :  { %1343 = vmatpush.bf16.msra.mxu0 %v2325_v23  ;;  %1044 = vmatmul.bf16.vlgmr.msrb.gmra.mxu1 %v2540_v26  ;;  %v2328_v26 = vld [vmem:[#allocation5 + $0x50] sm:$0xff] }
  0x93   :  { %1356 = vmatpush.bf16.msra.mxu1 %v2333_v24  ;;  %1057 = vmatmul.bf16.vlgmr.msrb.gmra.mxu2 %v2534_v17  ;;  %v2329_v17 = vld [vmem:[#allocation5 + $0x58] sm:$0xff] }
  0x94   :  { %1070 = vmatmul.bf16.vlgmr.msrb.gmra.mxu3 %v2538_v25  ;;  %v2318_v25 = vld [vmem:[#allocation5] sm:$0xff]  ;;  %1369 = vmatpush.bf16.msra.mxu2 %v2341_v42 }
  0x95   :  { %1382 = vmatpush.bf16.msra.mxu3 %v2349_v9  ;;  %v2367_v9 = vld [vmem:[%s2582_s6] ss:$0 sm:$0xff] }
  0x96   :  { %1344 = vmatpush.bf16.msra.mxu0 %v2324_v27  ;;  %v2343_v27 = vld [vmem:[#allocation5 + $0xc8] sm:$0xff] }
  0x97   :  { %1357 = vmatpush.bf16.msra.mxu1 %v2332_v30 }
  0x98   :  { %1370 = vmatpush.bf16.msra.mxu2 %v2340_v44 }
  0x99   :  { %1383 = vmatpush.bf16.msra.mxu3 %v2348_v11 }
  0x9a   :  { %1345 = vmatpush.bf16.msra.mxu0 %v2323_v28 }
  0x9b   :  { %1358 = vmatpush.bf16.msra.mxu1 %v2331_v32 }
  0x9c   :  { %1371 = vmatpush.bf16.msra.mxu2 %v2339_v50 }
  0x9d   :  { %1384 = vmatpush.bf16.msra.mxu3 %v2347_v14 }
  0x9e   :  { %1346 = vmatpush.bf16.msra.mxu0 %v2322_v29 }
  0x9f   :  { %1359 = vmatpush.bf16.msra.mxu1 %v2330_v18 }
  0xa0   :  { %1372 = vmatpush.bf16.msra.mxu2 %v2338_v54  ;;  %v2357_v54 = vld [vmem:[#allocation7 + $0x38] sm:$0xff] }
  0xa1   :  { %1385 = vmatpush.bf16.msra.mxu3 %v2346_v15 }
  0xa2   :  { %1347 = vmatpush.bf16.msra.mxu0 %v2321_v31 }
  0xa3   :  { %1360 = vmatpush.bf16.msra.mxu1 %v2329_v17 }
  0xa4   :  { %1373 = vmatpush.bf16.msra.mxu2 %v2337_v57  ;;  %v2354_v57 = vld [vmem:[#allocation7 + $0x20] sm:$0xff] }
  0xa5   :  { %1386 = vmatpush.bf16.msra.mxu3 %v2345_v16 }
  0xa6   :  { %1348 = vmatpush.bf16.msra.mxu0 %v2320_v33  ;;  %v2342_v33 = vld [vmem:[#allocation5 + $0xc0] sm:$0xff] }
  0xa7   :  { %1361 = vmatpush.bf16.msra.mxu1 %v2328_v26 }
  0xa8   :  { %1374 = vmatpush.bf16.msra.mxu2 %v2336_v62  ;;  %v2350_v62 = vld [vmem:[#allocation7] sm:$0xff] }
  0xa9   :  { %1387 = vmatpush.bf16.msra.mxu3 %v2344_v20 }
  0xaa   :  { %1349 = vmatpush.bf16.msra.mxu0 %v2319_v34 }
  0xab   :  { %1362 = vmatpush.bf16.msra.mxu1 %v2327_v37 }
  0xac   :  { %1375 = vmatpush.bf16.msra.mxu2 %v2335_v1 }
  0xad   :  { %1388 = vmatpush.bf16.msra.mxu3 %v2343_v27 }
  0xae   :  { %1350 = vmatpush.bf16.msra.mxu0 %v2318_v25 }
  0xaf   :  { %1363 = vmatpush.bf16.msra.mxu1 %v2326_v41 }
  0xb0   :  { %1376 = vmatpush.bf16.msra.mxu2 %v2334_v7 }
  0xb1   :  { %1389 = vmatpush.bf16.msra.mxu3 %v2342_v33 }
  0xb2   :  { %1465 = vmatpush.bf16.msrb.mxu0 %v2357_v54 }
  0xb8   :  { %v876_v38 = vpop.f32.mrf.mxu0 }
  0xb9   :  { %v877_v39 = vadd.f32 %v876_v38, %v219_v36  ;;  %v889_v40 = vpop.f32.mrf.mxu1  ;;  %v222_v36 = vperm.slane %v2561_v35, 3  ;;  %v2356_v35 = vld [vmem:[#allocation7 + $0x30] sm:$0xff] }
  0xba   :  { %1466 = vmatpush.bf16.msrb.mxu0 %v2356_v35 }
  0xbb   :  { %v890_v43 = vadd.f32 %v889_v40, %v877_v39 }
  0xbc   :  { %v902_v45 = vpop.f32.mrf.mxu2 }
  0xbd   :  { %v903_v46 = vadd.f32 %v902_v45, %v890_v43  ;;  %v915_v47 = vpop.f32.mrf.mxu3 }
  0xbf   :  { %v916_v48 = vadd.f32 %v915_v47, %v903_v46 }
  0xc0   :  { %v878_v49 = vpop.f32.mrf.mxu0 }
  0xc1   :  { %v891_v51 = vpop.f32.mrf.mxu1  ;;  %v1075_v52 = vmax.f32 %v916_v48, 0.0 }
  0xc3   :  { %v1079_v53 = vpack.c.bf16 %v1075_v52, %v1075_v52 }
  0xc4   :  { %v904_v55 = vpop.f32.mrf.mxu2 }
  0xc5   :  { %v917_v56 = vpop.f32.mrf.mxu3  ;;  %1351 = vmatmul.bf16.vlgmr.msra.gmra.mxu0 %v1079_v53 }
  0xc6   :  { %v2355_v56 = vld [vmem:[#allocation7 + $0x28] sm:$0xff] }
  0xc7   :  { %1467 = vmatpush.bf16.msrb.mxu0 %v2355_v56 }
  0xcb   :  { %1468 = vmatpush.bf16.msrb.mxu0 %v2354_v57 }
  0xce   :  { %v928_v59 = vpop.f32.mrf.mxu0 }
  0xcf   :  { %v929_v60 = vadd.f32 %v928_v59, %v220_v58  ;;  %v941_v61 = vpop.f32.mrf.mxu1  ;;  %v2353_v58 = vld [vmem:[#allocation7 + $0x18] sm:$0xff]  ;;  %v2352_v59 = vld [vmem:[#allocation7 + $0x10] sm:$0xff] }
  0xd0   :  { %1469 = vmatpush.bf16.msrb.mxu0 %v2353_v58 }
  0xd1   :  { %v942_v63 = vadd.f32 %v941_v61, %v929_v60  ;;  %v2351_v60 = vld [vmem:[#allocation7 + $0x8] sm:$0xff] }
  0xd4   :  { %1470 = vmatpush.bf16.msrb.mxu0 %v2352_v59 }
  0xd6   :  { %v954_v0 = vpop.f32.mrf.mxu2  ;;  %v930_v5 = vpop.f32.mrf.mxu0 }
  0xd7   :  { %v955_v2 = vadd.f32 %v954_v0, %v942_v63  ;;  %v967_v3 = vpop.f32.mrf.mxu3  ;;  %v943_v6 = vpop.f32.mrf.mxu1  ;;  %v2366_v0 = vld [vmem:[%s2580_s4] ss:$0 sm:$0xff]  ;;  %s2481_s4 = smov [#allocation8]  }
  0xd8   :  { %1471 = vmatpush.bf16.msrb.mxu0 %v2351_v60  ;;  %s1504_s6 = sshll.u32 %s2481_s4, 4  ;;  %s1505_s6 = int_to_ptr.vmem [resolvable:$true] %s1504_s6 }
  0xd9   :  { %v968_v4 = vadd.f32 %v967_v3, %v955_v2 }
  0xdb   :  { %v1076_v8 = vmax.f32 %v968_v4, 0.0 }
  0xdc   :  { %1472 = vmatpush.bf16.msrb.mxu0 %v2350_v62 }
  0xdd   :  { %v1080_v10 = vpack.c.bf16 %v1076_v8, %v1076_v8 }
  0xde   :  { %v956_v12 = vpop.f32.mrf.mxu2 }
  0xdf   :  { %1364 = vmatmul.bf16.vlgmr.msra.gmra.mxu1 %v1080_v10  ;;  %v969_v13 = vpop.f32.mrf.mxu3 }
  0xee   :  { %v980_v21 = vpop.f32.mrf.mxu0 }
  0xef   :  { %v981_v22 = vadd.f32 %v980_v21, %v221_v19  ;;  %v993_v23 = vpop.f32.mrf.mxu1 }
  0xf1   :  { %v994_v24 = vadd.f32 %v993_v23, %v981_v22 }
  0xf6   :  { %v1006_v28 = vpop.f32.mrf.mxu2  ;;  %v982_v32 = vpop.f32.mrf.mxu0 }
  0xf7   :  { %v1007_v29 = vadd.f32 %v1006_v28, %v994_v24  ;;  %v1019_v30 = vpop.f32.mrf.mxu3  ;;  %v995_v18 = vpop.f32.mrf.mxu1 }
  0xf9   :  { %v1020_v31 = vadd.f32 %v1019_v30, %v1007_v29 }
  0xfb   :  { %v1077_v34 = vmax.f32 %v1020_v31, 0.0 }
  0xfd   :  { %v1081_v17 = vpack.c.bf16 %v1077_v34, %v1077_v34 }
  0xfe   :  { %v1008_v25 = vpop.f32.mrf.mxu2 }
  0xff   :  { %1377 = vmatmul.bf16.vlgmr.msra.gmra.mxu2 %v1081_v17  ;;  %v1021_v26 = vpop.f32.mrf.mxu3 }
 0x10e   :  { %v1032_v37 = vpop.f32.mrf.mxu0 }
 0x10f   :  { %v1033_v38 = vadd.f32 %v1032_v37, %v222_v36  ;;  %v1045_v39 = vpop.f32.mrf.mxu1 }
 0x111   :  { %v1046_v40 = vadd.f32 %v1045_v39, %v1033_v38 }
 0x116   :  { %v1058_v41 = vpop.f32.mrf.mxu2  ;;  %v1034_v44 = vpop.f32.mrf.mxu0 }
 0x117   :  { %v1059_v42 = vadd.f32 %v1058_v41, %v1046_v40  ;;  %v1071_v43 = vpop.f32.mrf.mxu3  ;;  %v1047_v45 = vpop.f32.mrf.mxu1 }
 0x119   :  { %v1072_v46 = vadd.f32 %v1071_v43, %v1059_v42 }
 0x11b   :  { %v1078_v47 = vmax.f32 %v1072_v46, 0.0 }
 0x11d   :  { %v1082_v48 = vpack.c.bf16 %v1078_v47, %v1078_v47 }
 0x11e   :  { %v1060_v49 = vpop.f32.mrf.mxu2 }
 0x11f   :  { %v1073_v50 = vpop.f32.mrf.mxu3  ;;  %1390 = vmatmul.bf16.vlgmr.msra.gmra.mxu3 %v1082_v48 }
 0x142   :  { %v1352_v51 = vpop.f32.mrf.mxu0 }
 0x143   :  { %v1353_v1 = vadd.f32 %v2366_v0, %v1352_v51 }
 0x14a   :  { %v1354_v52 = vpop.f32.mrf.mxu0 }
 0x15c   :  { %v1365_v53 = vpop.f32.mrf.mxu1 }
 0x15d   :  { %v1366_v2 = vadd.f32 %v1365_v53, %v1353_v1 }
 0x164   :  { %v1367_v55 = vpop.f32.mrf.mxu1 }
 0x182   :  { %v1378_v61 = vpop.f32.mrf.mxu2 }
 0x183   :  { %v1379_v3 = vadd.f32 %v1378_v61, %v1366_v2 }
 0x18a   :  { %v1380_v63 = vpop.f32.mrf.mxu2 }
 0x1a2   :  { %v1391_v4 = vpop.f32.mrf.mxu3 }
 0x1a3   :  { %v1392_v5 = vadd.f32 %v1391_v4, %v1379_v3 }
 0x1a5   :  { %v1395_v6 = vmax.f32 %v1392_v5, 0.0 }
 0x1a7   :  { %v1396_v7 = vpack.c.bf16 %v1395_v6, %v1395_v6 }
 0x1a9   :  { %1473 = vmatmul.bf16.vlgmr.msrb.gmra.mxu0 %v1396_v7 }
 0x1aa   :  { %v1393_v8 = vpop.f32.mrf.mxu3 }
 0x226   :  { %v1474_v10 = vpop.f32.mrf.mxu0 }
 0x227   :  { %v1475_v11 = vadd.f32 %v2367_v9, %v1474_v10 }
 0x229   :  { %v2189_v12 = vmul.f32 -1.442695, %v1475_v11 }
 0x22b   :  { %2368 = vpow2.f32 %v2189_v12 }
 0x22e   :  { %v1476_v13 = vpop.f32.mrf.mxu0 }
 0x231   :  { %v2369_v14 = vpop.eup %2368 }
 0x232   :  { %v1481_v15 = vadd.f32 1.0, %v2369_v14 }
 0x234   :  { %2370 = vrcp.f32 %v1481_v15  ;;  %v1493_v21 = vand.u32 2147483648, %v1481_v15  ;;  %v1491_v23 = vand.u32 2147483647, %v1481_v15  ;;  %vm1487_vm1 = vweird.f32 %v1481_v15 }
 0x236   :  { %v1494_v27 = vor.u32 1.1754944e-38, %v1493_v21  ;;  %vm1492_vm3 = vcmp.eq.f32.partialorder %v1491_v23, 8.507059e+37 }
 0x23a   :  { %v2371_v16 = vpop.eup %2370 }
 0x23b   :  { %v1483_v19 = vmul.f32 %v2371_v16, %v1481_v15  ;;  %vm1488_vm0 = vweird.f32 %v2371_v16 }
 0x23c   :  { %vm1489_vm2 = vmor %vm1487_vm1, %vm1488_vm0 }
 0x23d   :  { %v1484_v20 = vsub.f32 1.0, %v1483_v19 }
 0x23f   :  { %v1485_v22 = vmul.f32 %v2371_v16, %v1484_v20 }
 0x241   :  { %v1486_v24 = vadd.f32 %v2371_v16, %v1485_v22 }
 0x243   :  { %v1490_v28 = vsel %vm1489_vm2, %v2371_v16, %v1486_v24 }
 0x244   :  { %v1495_v29 = vsel %vm1492_vm3, %v1494_v27, %v1490_v28 }
 0x245   :  { %v1497_v30 = vpack.c.bf16 %v1495_v29, %v1495_v29 }
 0x247   :  { %1498 = vst [vmem:[#allocation8] sm:$0x1] %v1497_v30 }
 0x248   :  { %1509 = dma.vmem_to_hbm [thread:$0]  %s1505_s6, 16, %s1507_s25, [#allocation4]  }
 0x249   :  { %2472 = dma.done.wait [#allocation4], 16  }
 0x24a   :  { %2473 = vsyncadd [#allocation4], 4294967280 }
 0x24b   :  { %1514 = vsyncpa [#allocation3], 1 }
 0x24c   :  { %1515 = vsyncpa [#allocation6], 1 }
 0x24d   :  { %1516 = vsyncpa [#allocation4], 1 }

</bundles_post_ra>
